<compile_context>
chip_gen: v5e
topology: v5e:2x2
jax: 0.10.0
libtpu: 0.0.40
codegen_flags: <defaults>
</compile_context>

<pallas_src>
import functools

import jax
import jax.numpy as jnp
import numpy as np
from jax.experimental import pallas as pl
from jax.experimental.pallas import tpu as pltpu

# ---------------- configuration (mirrors MCPHiddenLayers, big_model=False) ----
STATE_DIM = 24
GOAL_DIM = 8
ACTION_DIM = 6
NUM_PRIMITIVES = 4
HIDDEN = 64            # hidden_layer_sizes = [64, 64]
VF_HIDDEN = 64         # value_hidden_layer_sizes = [64, 64]
LATENT_VF = VF_HIDDEN
BATCH = 4
LEARN_LOG_STD = True   # forward_actor returns only the mixture mean

# ---------------- derived packed-layout sizes ---------------------------------
D_IN = STATE_DIM + GOAL_DIM            # 32
H4 = 4 * HIDDEN                        # 256 : [value | state | goal | prim]
CW = HIDDEN + NUM_PRIMITIVES * HIDDEN  # 320 : [gate hidden | prim hidden x4]
PA = NUM_PRIMITIVES * ACTION_DIM       # 24
DW = 3 * PA                            # 72  : [mu | log_std | replicated gate logits]
DW_PAD = 128                           # stage-D output padded to a full 128 lanes
OUT_PAD = HIDDEN                       # mean padded to 64 lanes
OUT_W = OUT_PAD + LATENT_VF            # 128 : [mean_pad | value]
BATCH_TILE = 128                       # rows per grid step for large batches


def _round8(n):
    return ((n + 7) // 8) * 8


# Merged-slab row layout (every region starts at a multiple of 8 sublanes).
ROWS1 = _round8(D_IN + 1)   # 40
ROWS2 = _round8(H4 + 1)     # 264
ROWS3 = _round8(H4 + 1)     # 264
ROWS4 = _round8(CW + 1)     # 328
R1 = 0
R2 = R1 + ROWS1             # 40
R3 = R2 + ROWS2             # 304
R4 = R3 + ROWS3             # 568
SLAB_ROWS = R4 + ROWS4      # 896
SLAB_LANES = CW             # 320


# ---------------- Pallas kernel ------------------------------------------------
def _mcp_kernel(feat_ref, slab_ref, out_ref):
    f = feat_ref[...]                                                  # (BT, 32)

    # Stage A: value / state-enc / goal-enc / prim-enc first layers, one matmul.
    w1 = slab_ref[R1:R1 + D_IN, 0:H4]
    b1 = slab_ref[R1 + D_IN:R1 + D_IN + 1, 0:H4]
    h1 = jnp.maximum(jnp.dot(f, w1, preferred_element_type=jnp.float32) + b1, 0.0)

    # Stage B: four second layers as one block-diagonal (256 x 256) matmul.
    # TODO(synk): on v5e this could be split into two 128x128 block dots to cut
    #             zero MACs / DMA bytes; kept fused for simplicity (v6e/v7x do
    #             it in one MXU pass anyway).
    w2 = slab_ref[R2:R2 + H4, 0:H4]
    b2 = slab_ref[R2 + H4:R2 + H4 + 1, 0:H4]
    h2 = jnp.maximum(jnp.dot(h1, w2, preferred_element_type=jnp.float32) + b2, 0.0)
    value = h2[:, :HIDDEN]                                             # critic latent

    # Stage C: gate L1 (reads state/goal embeds via packed weights) + prim L1.
    w3 = slab_ref[R3:R3 + H4, 0:CW]
    b3 = slab_ref[R3 + H4:R3 + H4 + 1, 0:CW]
    h3 = jnp.maximum(jnp.dot(h2, w3, preferred_element_type=jnp.float32) + b3, 0.0)

    # Stage D: primitive output layers + replicated gate logits, 128-lane output.
    w4 = slab_ref[R4:R4 + CW, 0:DW_PAD]
    b4 = slab_ref[R4 + CW:R4 + CW + 1, 0:DW_PAD]
    d = jnp.dot(h3, w4, preferred_element_type=jnp.float32) + b4       # (BT, 128)

    mus = d[:, 0:PA]                                                   # mu_i[a] at lane 6i+a
    log_std = d[:, PA:2 * PA]
    w_rep = jax.nn.sigmoid(d[:, 2 * PA:3 * PA])                        # gate weight_i per action lane
    v = w_rep * jnp.exp(-log_std)                                      # w_i / sigma_i (no divides)

    # Mixture helper generated in-kernel (no DMA): S[j, a] = 1 iff a == j % A,
    # built with iota + compares (no integer div/rem), plus a pad row keeping
    # denom = 1 on unused mean lanes.
    row = jax.lax.broadcasted_iota(jnp.int32, (PA, OUT_PAD), 0)
    col = jax.lax.broadcasted_iota(jnp.int32, (PA, OUT_PAD), 1)
    diff = row - col
    hit = diff == 0
    for i in range(1, NUM_PRIMITIVES):
        hit = hit | (diff == i * ACTION_DIM)
    S = jnp.where(hit & (col < ACTION_DIM), 1.0, 0.0)                  # (24, 64)
    lane = jax.lax.broadcasted_iota(jnp.int32, (1, OUT_PAD), 1)
    pad = jnp.where(lane >= ACTION_DIM, 1.0, 0.0)                      # (1, 64)

    denom = jnp.dot(v, S, preferred_element_type=jnp.float32) + pad    # (BT, 64)
    unnorm = jnp.dot(v * mus, S, preferred_element_type=jnp.float32)

    r = pl.reciprocal(denom, approx=True)
    r = r * (2.0 - denom * r)                                          # one Newton step -> ~f32 accuracy
    mean_pad = unnorm * r                                              # lanes >= ACTION_DIM are 0

    out_ref[...] = jnp.concatenate([mean_pad, value], axis=-1)         # single dense (BT, 128) store
    # TODO(synk): when learn_log_std=False the module also returns scale_tril = 1/denom.


# ---------------- wrapper -------------------------------------------------------
@functools.partial(jax.jit, static_argnames=("batch_tile",))
def mcp_forward(features, slab, batch_tile=BATCH_TILE):
    B = features.shape[0]
    bt = max(8, min(batch_tile, _round8(B)))
    num_tiles = pl.cdiv(B, bt)
    Bp = num_tiles * bt
    feats = features if Bp == B else jnp.pad(features, ((0, Bp - B), (0, 0)))

    out = pl.pallas_call(
        _mcp_kernel,
        out_shape=jax.ShapeDtypeStruct((Bp, OUT_W), jnp.float32),
        grid=(num_tiles,),
        in_specs=[
            pl.BlockSpec((bt, D_IN), lambda i: (i, 0)),
            # Constant index_map: the weight slab is DMA'd once and stays
            # resident in VMEM across all batch-grid steps.
            pl.BlockSpec((SLAB_ROWS, SLAB_LANES), lambda i: (0, 0)),
        ],
        out_specs=pl.BlockSpec((bt, OUT_W), lambda i: (i, 0)),
        compiler_params=pltpu.CompilerParams(
            dimension_semantics=(("parallel",) if num_tiles > 1 else ("arbitrary",))),
    )(feats, slab)

    mean = out[:B, :ACTION_DIM]
    value = out[:B, OUT_PAD:OUT_PAD + LATENT_VF]
    return mean, value


# ---------------- parameter construction (natural, PyTorch-equivalent layout) ---
def make_params(key):
    keys = iter(jax.random.split(key, 64))

    def lin(in_dim, out_dim):
        w = jax.random.normal(next(keys), (in_dim, out_dim), jnp.float32) * 0.1
        b = jax.random.normal(next(keys), (1, out_dim), jnp.float32) * 0.1
        return w, b

    se_w1, se_b1 = lin(STATE_DIM, HIDDEN)
    se_w2, se_b2 = lin(HIDDEN, HIDDEN)
    ge_w1, ge_b1 = lin(GOAL_DIM, HIDDEN)
    ge_w2, ge_b2 = lin(HIDDEN, HIDDEN)
    gt_w1, gt_b1 = lin(2 * HIDDEN, HIDDEN)
    gt_w2, gt_b2 = lin(HIDDEN, NUM_PRIMITIVES)
    pe_w1, pe_b1 = lin(STATE_DIM, HIDDEN)
    pe_w2, pe_b2 = lin(HIDDEN, HIDDEN)
    pr_w1 = jax.random.normal(next(keys), (NUM_PRIMITIVES, HIDDEN, HIDDEN), jnp.float32) * 0.1
    pr_b1 = jax.random.normal(next(keys), (NUM_PRIMITIVES, 1, HIDDEN), jnp.float32) * 0.1
    pr_w2 = jax.random.normal(next(keys), (NUM_PRIMITIVES, HIDDEN, 2 * ACTION_DIM), jnp.float32) * 0.1
    pr_b2 = jax.random.normal(next(keys), (NUM_PRIMITIVES, 1, 2 * ACTION_DIM), jnp.float32) * 0.1
    vn_w1, vn_b1 = lin(STATE_DIM + GOAL_DIM, VF_HIDDEN)
    vn_w2, vn_b2 = lin(VF_HIDDEN, LATENT_VF)

    return (
        se_w1, se_b1, se_w2, se_b2,
        ge_w1, ge_b1, ge_w2, ge_b2,
        gt_w1, gt_b1, gt_w2, gt_b2,
        pe_w1, pe_b1, pe_w2, pe_b2,
        pr_w1, pr_b1, pr_w2, pr_b2,
        vn_w1, vn_b1, vn_w2, vn_b2,
    )


# ---------------- pack natural params into ONE fused VMEM slab (done once) ------
def pack_params(params):
    (se_w1, se_b1, se_w2, se_b2,
     ge_w1, ge_b1, ge_w2, ge_b2,
     gt_w1, gt_b1, gt_w2, gt_b2,
     pe_w1, pe_b1, pe_w2, pe_b2,
     pr_w1, pr_b1, pr_w2, pr_b2,
     vn_w1, vn_b1, vn_w2, vn_b2) = [np.asarray(p, np.float32) for p in params]

    H, P, A = HIDDEN, NUM_PRIMITIVES, ACTION_DIM
    slab = np.zeros((SLAB_ROWS, SLAB_LANES), np.float32)

    # Stage A: column blocks [value | state-enc | goal-enc | prim-enc].
    w1 = np.zeros((D_IN, H4), np.float32)
    w1[:, 0:H] = vn_w1
    w1[:STATE_DIM, H:2 * H] = se_w1
    w1[STATE_DIM:, 2 * H:3 * H] = ge_w1
    w1[:STATE_DIM, 3 * H:4 * H] = pe_w1
    b1 = np.concatenate([vn_b1, se_b1, ge_b1, pe_b1], axis=-1)[0]
    slab[R1:R1 + D_IN, 0:H4] = w1
    slab[R1 + D_IN, 0:H4] = b1

    # Stage B: block-diagonal second layers (same block order).
    w2 = np.zeros((H4, H4), np.float32)
    for k, w in enumerate([vn_w2, se_w2, ge_w2, pe_w2]):
        w2[k * H:(k + 1) * H, k * H:(k + 1) * H] = w
    b2 = np.concatenate([vn_b2, se_b2, ge_b2, pe_b2], axis=-1)[0]
    slab[R2:R2 + H4, 0:H4] = w2
    slab[R2 + H4, 0:H4] = b2

    # Stage C: gate L1 (reads state/goal embeds, lanes 64:192) + primitive L1.
    w3 = np.zeros((H4, CW), np.float32)
    b3 = np.zeros((CW,), np.float32)
    w3[H:3 * H, 0:H] = gt_w1
    b3[0:H] = gt_b1[0]
    for i in range(P):
        w3[3 * H:4 * H, H + i * H:H + (i + 1) * H] = pr_w1[i]
        b3[H + i * H:H + (i + 1) * H] = pr_b1[i, 0]
    slab[R3:R3 + H4, 0:CW] = w3
    slab[R3 + H4, 0:CW] = b3

    # Stage D: primitive L2 split into mu / log_std column groups + gate L2
    # logits replicated once per action lane; padded to 128 output lanes.
    w4 = np.zeros((CW, DW), np.float32)
    b4 = np.zeros((DW,), np.float32)
    for i in range(P):
        r0 = H + i * H
        w4[r0:r0 + H, i * A:(i + 1) * A] = pr_w2[i][:, :A]
        w4[r0:r0 + H, PA + i * A:PA + (i + 1) * A] = pr_w2[i][:, A:]
        b4[i * A:(i + 1) * A] = pr_b2[i, 0, :A]
        b4[PA + i * A:PA + (i + 1) * A] = pr_b2[i, 0, A:]
        w4[0:H, 2 * PA + i * A:2 * PA + (i + 1) * A] = np.repeat(gt_w2[:, i:i + 1], A, axis=1)
        b4[2 * PA + i * A:2 * PA + (i + 1) * A] = gt_b2[0, i]
    slab[R4:R4 + CW, 0:DW] = w4
    slab[R4 + CW, 0:DW] = b4

    return jnp.asarray(slab)


# ---------------- pure-JAX reference (operates on the natural params) -----------
def mcp_forward_ref(features, params):
    (se_w1, se_b1, se_w2, se_b2,
     ge_w1, ge_b1, ge_w2, ge_b2,
     gt_w1, gt_b1, gt_w2, gt_b2,
     pe_w1, pe_b1, pe_w2, pe_b2,
     pr_w1, pr_b1, pr_w2, pr_b2,
     vn_w1, vn_b1, vn_w2, vn_b2) = params

    relu = jax.nn.relu
    state = features[:, :STATE_DIM]
    goal = features[:, STATE_DIM:]

    def mlp2(x, w1, b1, w2, b2):
        return relu(relu(x @ w1 + b1) @ w2 + b2)

    s_e = mlp2(state, se_w1, se_b1, se_w2, se_b2)
    g_e = mlp2(goal, ge_w1, ge_b1, ge_w2, ge_b2)
    emb = jnp.concatenate([s_e, g_e], -1)
    weights = jax.nn.sigmoid(relu(emb @ gt_w1 + gt_b1) @ gt_w2 + gt_b2)   # (B, P)
    prim_embed = mlp2(state, pe_w1, pe_b1, pe_w2, pe_b2)

    mus, sigmas = [], []
    for i in range(NUM_PRIMITIVES):
        out = relu(prim_embed @ pr_w1[i] + pr_b1[i]) @ pr_w2[i] + pr_b2[i]
        mus.append(out[:, :ACTION_DIM])
        sigmas.append(jnp.exp(out[:, ACTION_DIM:]))
    mus = jnp.stack(mus, 1)        # (B, P, A)
    sigmas = jnp.stack(sigmas, 1)  # (B, P, A)
    w = weights[..., None]         # (B, P, 1)
    denom = (w / sigmas).sum(-2)
    mean = (w / sigmas * mus).sum(-2) / denom
    value = mlp2(features, vn_w1, vn_b1, vn_w2, vn_b2)
    return mean, value


# ---------------- main -----------------------------------------------------------
if __name__ == "__main__":
    key = jax.random.PRNGKey(0)
    k_feat, k_params, k_big = jax.random.split(key, 3)
    features = jax.random.normal(k_feat, (BATCH, STATE_DIM + GOAL_DIM), jnp.float32)
    params = make_params(k_params)
    slab = pack_params(params)   # packed once; re-used across forward calls

    # Small-batch run (single grid step).
    mean, value = mcp_forward(features, slab)
    jax.block_until_ready((mean, value))

    with jax.default_matmul_precision("highest"):
        mean_ref, value_ref = mcp_forward_ref(features, params)
    np.testing.assert_allclose(np.asarray(mean), np.asarray(mean_ref), rtol=1e-4, atol=1e-4)
    np.testing.assert_allclose(np.asarray(value), np.asarray(value_ref), rtol=1e-4, atol=1e-4)
    assert mean.shape == (BATCH, ACTION_DIM)
    assert value.shape == (BATCH, LATENT_VF)

    # Larger batch exercises the multi-tile batch grid (weights resident across
    # grid steps; batch axis sharded across TensorCores on v7x).
    big = jax.random.normal(k_big, (256, STATE_DIM + GOAL_DIM), jnp.float32)
    mean_b, value_b = mcp_forward(big, slab)
    jax.block_until_ready((mean_b, value_b))
    with jax.default_matmul_precision("highest"):
        mean_b_ref, value_b_ref = mcp_forward_ref(big, params)
    np.testing.assert_allclose(np.asarray(mean_b), np.asarray(mean_b_ref), rtol=1e-4, atol=1e-4)
    np.testing.assert_allclose(np.asarray(value_b), np.asarray(value_b_ref), rtol=1e-4, atol=1e-4)

    print("KERNEL_OK")
</pallas_src>

<mosaic_0001>
module attributes {stable_mosaic.version = 11 : i64} {
  func.func @_mcp_kernel(%arg0: i32, %arg1: memref<8x32xf32, #tpu.memory_space<vmem>>, %arg2: memref<896x320xf32, #tpu.memory_space<vmem>>, %arg3: memref<8x128xf32, #tpu.memory_space<vmem>>) attributes {dimension_semantics = [#tpu.dimension_semantics<arbitrary>], iteration_bounds = array<i64: 1>, scalar_prefetch = 0 : i64, scratch_operands = 0 : i64, tpu.core_type = #tpu.core_type<tc>, window_params = [{transform_indices = @transform_0, window_bounds = array<i64: 8, 32>}, {pipeline_mode = #tpu.pipeline_mode<synchronous>, transform_indices = @transform_1, window_bounds = array<i64: 896, 320>}, {transform_indices = @transform_2, window_bounds = array<i64: 8, 128>}]} {
    %c0 = arith.constant 0 : index
    %c0_0 = arith.constant 0 : index
    %0 = vector.load %arg1[%c0, %c0_0] : memref<8x32xf32, #tpu.memory_space<vmem>>, vector<8x32xf32>
    %c0_1 = arith.constant 0 : index
    %c0_2 = arith.constant 0 : index
    %1 = vector.load %arg2[%c0_1, %c0_2] : memref<896x320xf32, #tpu.memory_space<vmem>>, vector<32x256xf32>
    %c32 = arith.constant 32 : index
    %c0_3 = arith.constant 0 : index
    %2 = vector.load %arg2[%c32, %c0_3] : memref<896x320xf32, #tpu.memory_space<vmem>>, vector<1x256xf32>
    %cst = arith.constant dense<0.000000e+00> : vector<8x256xf32>
    %3 = tpu.matmul %0, %1, %cst {dimension_numbers = #tpu.dot_dimension_numbers<[1], [0], [0], [1], [0, 0, 1, 1], [], []>} : vector<8x32xf32>, vector<32x256xf32>, vector<8x256xf32> -> vector<8x256xf32>
    %4 = vector.broadcast %2 : vector<1x256xf32> to vector<8x256xf32>
    %5 = arith.addf %3, %4 : vector<8x256xf32>
    %cst_4 = arith.constant 0.000000e+00 : f32
    %6 = vector.broadcast %cst_4 : f32 to vector<8x256xf32>
    %7 = arith.maximumf %5, %6 : vector<8x256xf32>
    %c40 = arith.constant 40 : index
    %c0_5 = arith.constant 0 : index
    %8 = vector.load %arg2[%c40, %c0_5] : memref<896x320xf32, #tpu.memory_space<vmem>>, vector<256x256xf32>
    %c296 = arith.constant 296 : index
    %c0_6 = arith.constant 0 : index
    %9 = vector.load %arg2[%c296, %c0_6] : memref<896x320xf32, #tpu.memory_space<vmem>>, vector<1x256xf32>
    %cst_7 = arith.constant dense<0.000000e+00> : vector<8x256xf32>
    %10 = tpu.matmul %7, %8, %cst_7 {dimension_numbers = #tpu.dot_dimension_numbers<[1], [0], [0], [1], [0, 0, 1, 1], [], []>} : vector<8x256xf32>, vector<256x256xf32>, vector<8x256xf32> -> vector<8x256xf32>
    %11 = vector.broadcast %9 : vector<1x256xf32> to vector<8x256xf32>
    %12 = arith.addf %10, %11 : vector<8x256xf32>
    %cst_8 = arith.constant 0.000000e+00 : f32
    %13 = vector.broadcast %cst_8 : f32 to vector<8x256xf32>
    %14 = arith.maximumf %12, %13 : vector<8x256xf32>
    %15 = vector.extract_strided_slice %14 {offsets = [0, 0], sizes = [8, 64], strides = [1, 1]} : vector<8x256xf32> to vector<8x64xf32>
    %c304 = arith.constant 304 : index
    %c0_9 = arith.constant 0 : index
    %16 = vector.load %arg2[%c304, %c0_9] : memref<896x320xf32, #tpu.memory_space<vmem>>, vector<256x320xf32>
    %c560 = arith.constant 560 : index
    %c0_10 = arith.constant 0 : index
    %17 = vector.load %arg2[%c560, %c0_10] : memref<896x320xf32, #tpu.memory_space<vmem>>, vector<1x320xf32>
    %cst_11 = arith.constant dense<0.000000e+00> : vector<8x320xf32>
    %18 = tpu.matmul %14, %16, %cst_11 {dimension_numbers = #tpu.dot_dimension_numbers<[1], [0], [0], [1], [0, 0, 1, 1], [], []>} : vector<8x256xf32>, vector<256x320xf32>, vector<8x320xf32> -> vector<8x320xf32>
    %19 = vector.broadcast %17 : vector<1x320xf32> to vector<8x320xf32>
    %20 = arith.addf %18, %19 : vector<8x320xf32>
    %cst_12 = arith.constant 0.000000e+00 : f32
    %21 = vector.broadcast %cst_12 : f32 to vector<8x320xf32>
    %22 = arith.maximumf %20, %21 : vector<8x320xf32>
    %c568 = arith.constant 568 : index
    %c0_13 = arith.constant 0 : index
    %23 = vector.load %arg2[%c568, %c0_13] : memref<896x320xf32, #tpu.memory_space<vmem>>, vector<320x128xf32>
    %c888 = arith.constant 888 : index
    %c0_14 = arith.constant 0 : index
    %24 = vector.load %arg2[%c888, %c0_14] : memref<896x320xf32, #tpu.memory_space<vmem>>, vector<1x128xf32>
    %cst_15 = arith.constant dense<0.000000e+00> : vector<8x128xf32>
    %25 = tpu.matmul %22, %23, %cst_15 {dimension_numbers = #tpu.dot_dimension_numbers<[1], [0], [0], [1], [0, 0, 1, 1], [], []>} : vector<8x320xf32>, vector<320x128xf32>, vector<8x128xf32> -> vector<8x128xf32>
    %26 = vector.broadcast %24 : vector<1x128xf32> to vector<8x128xf32>
    %27 = arith.addf %25, %26 : vector<8x128xf32>
    %28 = vector.extract_strided_slice %27 {offsets = [0, 0], sizes = [8, 24], strides = [1, 1]} : vector<8x128xf32> to vector<8x24xf32>
    %29 = vector.extract_strided_slice %27 {offsets = [0, 24], sizes = [8, 24], strides = [1, 1]} : vector<8x128xf32> to vector<8x24xf32>
    %30 = vector.extract_strided_slice %27 {offsets = [0, 48], sizes = [8, 24], strides = [1, 1]} : vector<8x128xf32> to vector<8x24xf32>
    %31 = arith.negf %30 : vector<8x24xf32>
    %32 = math.exp %31 : vector<8x24xf32>
    %cst_16 = arith.constant 1.000000e+00 : f32
    %33 = vector.broadcast %cst_16 : f32 to vector<8x24xf32>
    %34 = arith.addf %33, %32 : vector<8x24xf32>
    %35 = arith.divf %33, %34 : vector<8x24xf32>
    %cst_17 = arith.constant 0.000000e+00 : f32
    %36 = vector.broadcast %cst_17 : f32 to vector<8x24xf32>
    %37 = arith.subf %36, %29 : vector<8x24xf32>
    %38 = math.exp %37 : vector<8x24xf32>
    %39 = arith.mulf %35, %38 : vector<8x24xf32>
    %40 = tpu.iota {dimensions = array<i32: 0>} : vector<24x64xi32>
    %41 = tpu.iota {dimensions = array<i32: 1>} : vector<24x64xi32>
    %42 = arith.subi %40, %41 : vector<24x64xi32>
    %c0_i32 = arith.constant 0 : i32
    %43 = vector.broadcast %c0_i32 : i32 to vector<24x64xi32>
    %44 = arith.cmpi eq, %42, %43 : vector<24x64xi32>
    %c6_i32 = arith.constant 6 : i32
    %45 = vector.broadcast %c6_i32 : i32 to vector<24x64xi32>
    %46 = arith.cmpi eq, %42, %45 : vector<24x64xi32>
    %47 = arith.ori %44, %46 : vector<24x64xi1>
    %c12_i32 = arith.constant 12 : i32
    %48 = vector.broadcast %c12_i32 : i32 to vector<24x64xi32>
    %49 = arith.cmpi eq, %42, %48 : vector<24x64xi32>
    %50 = arith.ori %47, %49 : vector<24x64xi1>
    %c18_i32 = arith.constant 18 : i32
    %51 = vector.broadcast %c18_i32 : i32 to vector<24x64xi32>
    %52 = arith.cmpi eq, %42, %51 : vector<24x64xi32>
    %53 = arith.ori %50, %52 : vector<24x64xi1>
    %c6_i32_18 = arith.constant 6 : i32
    %54 = vector.broadcast %c6_i32_18 : i32 to vector<24x64xi32>
    %55 = arith.cmpi slt, %41, %54 : vector<24x64xi32>
    %56 = arith.andi %53, %55 : vector<24x64xi1>
    %cst_19 = arith.constant 1.000000e+00 : f32
    %cst_20 = arith.constant 0.000000e+00 : f32
    %57 = vector.broadcast %cst_19 : f32 to vector<24x64xf32>
    %58 = vector.broadcast %cst_20 : f32 to vector<24x64xf32>
    %59 = arith.select %56, %57, %58 : vector<24x64xi1>, vector<24x64xf32>
    %60 = tpu.iota {dimensions = array<i32: 1>} : vector<1x64xi32>
    %c6_i32_21 = arith.constant 6 : i32
    %61 = vector.broadcast %c6_i32_21 : i32 to vector<1x64xi32>
    %62 = arith.cmpi sge, %60, %61 : vector<1x64xi32>
    %cst_22 = arith.constant 1.000000e+00 : f32
    %cst_23 = arith.constant 0.000000e+00 : f32
    %63 = vector.broadcast %cst_22 : f32 to vector<1x64xf32>
    %64 = vector.broadcast %cst_23 : f32 to vector<1x64xf32>
    %65 = arith.select %62, %63, %64 : vector<1x64xi1>, vector<1x64xf32>
    %cst_24 = arith.constant dense<0.000000e+00> : vector<8x64xf32>
    %66 = tpu.matmul %39, %59, %cst_24 {dimension_numbers = #tpu.dot_dimension_numbers<[1], [0], [0], [1], [0, 0, 1, 1], [], []>} : vector<8x24xf32>, vector<24x64xf32>, vector<8x64xf32> -> vector<8x64xf32>
    %67 = vector.broadcast %65 : vector<1x64xf32> to vector<8x64xf32>
    %68 = arith.addf %66, %67 : vector<8x64xf32>
    %69 = arith.mulf %39, %28 : vector<8x24xf32>
    %cst_25 = arith.constant dense<0.000000e+00> : vector<8x64xf32>
    %70 = tpu.matmul %69, %59, %cst_25 {dimension_numbers = #tpu.dot_dimension_numbers<[1], [0], [0], [1], [0, 0, 1, 1], [], []>} : vector<8x24xf32>, vector<24x64xf32>, vector<8x64xf32> -> vector<8x64xf32>
    %71 = tpu.reciprocal %68 {approx = true} : vector<8x64xf32> -> vector<8x64xf32>
    %72 = arith.mulf %68, %71 : vector<8x64xf32>
    %cst_26 = arith.constant 2.000000e+00 : f32
    %73 = vector.broadcast %cst_26 : f32 to vector<8x64xf32>
    %74 = arith.subf %73, %72 : vector<8x64xf32>
    %75 = arith.mulf %71, %74 : vector<8x64xf32>
    %76 = arith.mulf %70, %75 : vector<8x64xf32>
    %77 = tpu.concatenate %76, %15 in 1 : vector<8x64xf32>, vector<8x64xf32> -> vector<8x128xf32>
    %c0_27 = arith.constant 0 : index
    %c0_28 = arith.constant 0 : index
    %78 = vector.load %arg3[%c0_27, %c0_28] : memref<8x128xf32, #tpu.memory_space<vmem>>, vector<8x128xf32>
    tpu.vector_store %arg3[%c0_27, %c0_28], %77 {strides = array<i32>} : memref<8x128xf32, #tpu.memory_space<vmem>>, vector<8x128xf32>,
    return
  }
  func.func @transform_0(%arg0: i32) -> (i32, i32) {
    %c0_i32 = arith.constant 0 : i32
    %c0_i32_0 = arith.constant 0 : i32
    return %arg0, %c0_i32 : i32, i32
  }
  func.func @transform_1(%arg0: i32) -> (i32, i32) {
    %c0_i32 = arith.constant 0 : i32
    %c0_i32_0 = arith.constant 0 : i32
    %c0_i32_1 = arith.constant 0 : i32
    return %c0_i32, %c0_i32_0 : i32, i32
  }
  func.func @transform_2(%arg0: i32) -> (i32, i32) {
    %c0_i32 = arith.constant 0 : i32
    %c0_i32_0 = arith.constant 0 : i32
    return %arg0, %c0_i32 : i32, i32
  }
}

</mosaic_0001>

<bundles_post_ra>
// kernel: mcp_forward.1
= control target key start
LH: loop header
LB: loop body
LE: loop exit
PB: predicated region body
PF: predicated region fallthrough
CT: control target
= control target key end

     0   :  { %vm27_vm0 = vcmask 261120   ;;  %s723_s4 = smov 64   ;;  %vm1402_vm1 = vcmask 523264   ;;  %s724_s30 = smov 24   ;;  %s1399_s1 = inlined_call_operand.vmem [shape: f32[896,320], index: 1, kind: input, shape index: {}]   ;;  %s1400_s0 = inlined_call_operand.vmem [shape: f32[8,32], index: 0, kind: input, shape index: {}]   ;;  %s1401_s2 = inlined_call_operand.vmem [shape: f32[8,128], index: 2, kind: output, shape index: {}]  }
   0x1   :  { %v18_v0 = vld [vmem:[%s1399_s1 + $0x48] sm:$0xff]  ;;  %v16_v1 = vld [vmem:[%s1399_s1 + $0x30] sm:$0xff]  ;;  %v17_v3 = vld [vmem:[%s1399_s1 + $0x38] sm:$0xff]  ;;  %s725_s3 = smov 48  }
   0x2   :  { %v19_v2 = vld [vmem:[%s1399_s1 + $0x50] sm:$0xff]  ;;  %43 = vmatpush.msra.mxu0 %v18_v0  ;;  %v14_v4 = vld [vmem:[%s1399_s1 + $0x18] sm:$0xff]  ;;  %v15_v5 = vld [vmem:[%s1399_s1 + $0x20] sm:$0xff] }
   0x3   :  { %63 = vmatpush.msra.mxu1 %v19_v2  ;;  %v103_v6 = vld [vmem:[%s1399_s1 + $0x1e0] sm:$0xff]  ;;  %v101_v7 = vld [vmem:[%s1399_s1 + $0x1c8] sm:$0xff]  ;;  %v99_v14 = vld [vmem:[%s1399_s1 + $0x1b0] sm:$0xff] }
   0x4   :  { %44 = vmatpush.msra.mxu0 %v16_v1  ;;  %v12_v8 = vld [vmem:[%s1399_s1] sm:$0xff]  ;;  %v13_v9 = vld [vmem:[%s1399_s1 + $0x8] sm:$0xff]  ;;  %144 = vmatpush.msra.mxu2 %v103_v6  ;;  %v102_v16 = vld [vmem:[%s1399_s1 + $0x1d0] sm:$0xff] }
   0x5   :  { %64 = vmatpush.msra.mxu1 %v17_v3  ;;  %v135_v10 = vld [vmem:[%s1399_s1 + $0x360] sm:$0xff]  ;;  %v104_v12 = vld [vmem:[%s1399_s1 + $0x1e8] sm:$0xff]  ;;  %v134_v17 = vld [vmem:[%s1399_s1 + $0x350] sm:$0xff] }
   0x6   :  { %45 = vmatpush.msra.mxu0 %v14_v4  ;;  %v11_v11 = vld [vmem:[%s1400_s0] sm:$0xff]  ;;  %145 = vmatpush.msra.mxu2 %v101_v7  ;;  %v136_v13 = vld [vmem:[%s1399_s1 + $0x368] sm:$0xff]  ;;  %v97_v18 = vld [vmem:[%s1399_s1 + $0x198] sm:$0xff] }
   0x7   :  { %65 = vmatpush.msra.mxu1 %v15_v5  ;;  %164 = vmatpush.msra.mxu3 %v135_v10  ;;  %v133_v15 = vld [vmem:[%s1399_s1 + $0x348] sm:$0xff]  ;;  %v131_v19 = vld [vmem:[%s1399_s1 + $0x330] sm:$0xff]  ;;  %v100_v20 = vld [vmem:[%s1399_s1 + $0x1b8] sm:$0xff] }
   0x8   :  { %46 = vmatpush.msra.mxu0 %v12_v8  ;;  %146 = vmatpush.msra.mxu2 %v99_v14  ;;  %v132_v21 = vld [vmem:[%s1399_s1 + $0x338] sm:$0xff]  ;;  %v95_v22 = vld [vmem:[%s1399_s1 + $0x180] sm:$0xff]  ;;  %v93_v26 = vld [vmem:[%s1399_s1 + $0x168] sm:$0xff] }
   0x9   :  { %66 = vmatpush.msra.mxu1 %v13_v9  ;;  %697 = vmatmul.msk.f32.vlgmr.msra.gmra.mxu0 %vm27_vm0, %v11_v11  ;;  %v129_v23 = vld [vmem:[%s1399_s1 + $0x318] sm:$0xff]  ;;  %v98_v24 = vld [vmem:[%s1399_s1 + $0x1a0] sm:$0xff]  ;;  %v96_v28 = vld [vmem:[%s1399_s1 + $0x188] sm:$0xff] }
   0xa   :  { %698 = vmatmul.msk.f32.vlgmr.msra.gmra.mxu1 %vm27_vm0, %v11_v11  ;;  %184 = vmatpush.msrb.mxu0 %v104_v12  ;;  %v130_v25 = vld [vmem:[%s1399_s1 + $0x320] sm:$0xff]  ;;  %v128_v29 = vld [vmem:[%s1399_s1 + $0x308] sm:$0xff]  ;;  %v91_v30 = vld [vmem:[%s1399_s1 + $0x150] sm:$0xff] }
   0xb   :  { %204 = vmatpush.msrb.mxu1 %v136_v13  ;;  %165 = vmatpush.msra.mxu3 %v133_v15  ;;  %v127_v27 = vld [vmem:[%s1399_s1 + $0x300] sm:$0xff]  ;;  %v125_v31 = vld [vmem:[%s1399_s1 + $0x2e8] sm:$0xff]  ;;  %v94_v32 = vld [vmem:[%s1399_s1 + $0x170] sm:$0xff] }
   0xc   :  { %185 = vmatpush.msrb.mxu0 %v102_v16  ;;  %147 = vmatpush.msra.mxu2 %v97_v18  ;;  %v126_v33 = vld [vmem:[%s1399_s1 + $0x2f0] sm:$0xff]  ;;  %v89_v34 = vld [vmem:[%s1399_s1 + $0x138] sm:$0xff]  ;;  %v87_v38 = vld [vmem:[%s1399_s1 + $0x120] sm:$0xff] }
   0xd   :  { %205 = vmatpush.msrb.mxu1 %v134_v17  ;;  %166 = vmatpush.msra.mxu3 %v131_v19  ;;  %v123_v35 = vld [vmem:[%s1399_s1 + $0x2d0] sm:$0xff]  ;;  %v92_v36 = vld [vmem:[%s1399_s1 + $0x158] sm:$0xff]  ;;  %v90_v40 = vld [vmem:[%s1399_s1 + $0x140] sm:$0xff] }
   0xe   :  { %186 = vmatpush.msrb.mxu0 %v100_v20  ;;  %148 = vmatpush.msra.mxu2 %v95_v22  ;;  %v124_v37 = vld [vmem:[%s1399_s1 + $0x2d8] sm:$0xff]  ;;  %v122_v41 = vld [vmem:[%s1399_s1 + $0x2c0] sm:$0xff]  ;;  %v85_v42 = vld [vmem:[%s1399_s1 + $0x108] sm:$0xff] }
   0xf   :  { %206 = vmatpush.msrb.mxu1 %v132_v21  ;;  %167 = vmatpush.msra.mxu3 %v129_v23  ;;  %v121_v39 = vld [vmem:[%s1399_s1 + $0x2b8] sm:$0xff]  ;;  %v119_v43 = vld [vmem:[%s1399_s1 + $0x2a0] sm:$0xff]  ;;  %v88_v44 = vld [vmem:[%s1399_s1 + $0x128] sm:$0xff] }
  0x10   :  { %187 = vmatpush.msrb.mxu0 %v98_v24  ;;  %149 = vmatpush.msra.mxu2 %v93_v26  ;;  %v120_v45 = vld [vmem:[%s1399_s1 + $0x2a8] sm:$0xff]  ;;  %v83_v46 = vld [vmem:[%s1399_s1 + $0xf0] sm:$0xff]  ;;  %v81_v50 = vld [vmem:[%s1399_s1 + $0xd8] sm:$0xff] }
  0x11   :  { %207 = vmatpush.msrb.mxu1 %v130_v25  ;;  %168 = vmatpush.msra.mxu3 %v127_v27  ;;  %v117_v47 = vld [vmem:[%s1399_s1 + $0x288] sm:$0xff]  ;;  %v86_v48 = vld [vmem:[%s1399_s1 + $0x110] sm:$0xff]  ;;  %v84_v52 = vld [vmem:[%s1399_s1 + $0xf8] sm:$0xff] }
  0x12   :  { %188 = vmatpush.msrb.mxu0 %v96_v28  ;;  %150 = vmatpush.msra.mxu2 %v91_v30  ;;  %v118_v49 = vld [vmem:[%s1399_s1 + $0x290] sm:$0xff]  ;;  %v116_v53 = vld [vmem:[%s1399_s1 + $0x278] sm:$0xff]  ;;  %v79_v54 = vld [vmem:[%s1399_s1 + $0xc0] sm:$0xff] }
  0x13   :  { %208 = vmatpush.msrb.mxu1 %v128_v29  ;;  %169 = vmatpush.msra.mxu3 %v125_v31  ;;  %v115_v51 = vld [vmem:[%s1399_s1 + $0x270] sm:$0xff]  ;;  %v113_v55 = vld [vmem:[%s1399_s1 + $0x258] sm:$0xff]  ;;  %v82_v56 = vld [vmem:[%s1399_s1 + $0xe0] sm:$0xff] }
  0x14   :  { %189 = vmatpush.msrb.mxu0 %v94_v32  ;;  %151 = vmatpush.msra.mxu2 %v89_v34  ;;  %v114_v57 = vld [vmem:[%s1399_s1 + $0x260] sm:$0xff]  ;;  %v80_v58 = vld [vmem:[%s1399_s1 + $0xc8] sm:$0xff]  ;;  %v78_v61 = vld [vmem:[%s1399_s1 + $0xb0] sm:$0xff] }
  0x15   :  { %209 = vmatpush.msrb.mxu1 %v126_v33  ;;  %170 = vmatpush.msra.mxu3 %v123_v35  ;;  %v77_v59 = vld [vmem:[%s1399_s1 + $0xa8] sm:$0xff]  ;;  %v111_v60 = vld [vmem:[%s1399_s1 + $0x240] sm:$0xff]  ;;  %v75_v63 = vld [vmem:[%s1399_s1 + $0x90] sm:$0xff] }
  0x16   :  { %190 = vmatpush.msrb.mxu0 %v92_v36  ;;  %152 = vmatpush.msra.mxu2 %v87_v38  ;;  %v112_v62 = vld [vmem:[%s1399_s1 + $0x248] sm:$0xff]  ;;  %v76_v1 = vld [vmem:[%s1399_s1 + $0x98] sm:$0xff]  ;;  %v110_v2 = vld [vmem:[%s1399_s1 + $0x230] sm:$0xff] }
  0x17   :  { %210 = vmatpush.msrb.mxu1 %v124_v37  ;;  %171 = vmatpush.msra.mxu3 %v121_v39  ;;  %v109_v0 = vld [vmem:[%s1399_s1 + $0x228] sm:$0xff]  ;;  %v73_v3 = vld [vmem:[%s1399_s1 + $0x78] sm:$0xff]  ;;  %v107_v4 = vld [vmem:[%s1399_s1 + $0x210] sm:$0xff] }
  0x18   :  { %191 = vmatpush.msrb.mxu0 %v90_v40  ;;  %153 = vmatpush.msra.mxu2 %v85_v42  ;;  %v74_v5 = vld [vmem:[%s1399_s1 + $0x80] sm:$0xff]  ;;  %v108_v6 = vld [vmem:[%s1399_s1 + $0x218] sm:$0xff]  ;;  %v313_v13 = vld [vmem:[%s1399_s1 + $0x648] sm:$0xff] }
  0x19   :  { %211 = vmatpush.msrb.mxu1 %v122_v41  ;;  %172 = vmatpush.msra.mxu3 %v119_v43  ;;  %v105_v7 = vld [vmem:[%s1399_s1 + $0x1f8] sm:$0xff]  ;;  %v106_v8 = vld [vmem:[%s1399_s1 + $0x200] sm:$0xff]  ;;  %v265_v14 = vld [vmem:[%s1399_s1 + $0x4c8] sm:$0xff] }
  0x1a   :  { %192 = vmatpush.msrb.mxu0 %v88_v44  ;;  %154 = vmatpush.msra.mxu2 %v83_v46  ;;  %v319_v9 = vld [vmem:[%s1399_s1 + $0x678] sm:$0xff]  ;;  %v316_v10 = vld [vmem:[%s1399_s1 + $0x660] sm:$0xff]  ;;  %v310_v15 = vld [vmem:[%s1399_s1 + $0x630] sm:$0xff] }
  0x1b   :  { %212 = vmatpush.msrb.mxu1 %v120_v45  ;;  %173 = vmatpush.msra.mxu3 %v117_v47  ;;  %v271_v11 = vld [vmem:[%s1399_s1 + $0x4f8] sm:$0xff]  ;;  %v268_v12 = vld [vmem:[%s1399_s1 + $0x4e0] sm:$0xff]  ;;  %v262_v16 = vld [vmem:[%s1399_s1 + $0x4b0] sm:$0xff] }
  0x1c   :  { %193 = vmatpush.msrb.mxu0 %v86_v48  ;;  %155 = vmatpush.msra.mxu2 %v81_v50  ;;  %v307_v17 = vld [vmem:[%s1399_s1 + $0x618] sm:$0xff]  ;;  %v320_v19 = vld [vmem:[%s1399_s1 + $0x680] sm:$0xff]  ;;  %v317_v21 = vld [vmem:[%s1399_s1 + $0x668] sm:$0xff] }
  0x1d   :  { %213 = vmatpush.msrb.mxu1 %v118_v49  ;;  %174 = vmatpush.msra.mxu3 %v115_v51  ;;  %v259_v18 = vld [vmem:[%s1399_s1 + $0x498] sm:$0xff]  ;;  %v304_v20 = vld [vmem:[%s1399_s1 + $0x600] sm:$0xff]  ;;  %v314_v23 = vld [vmem:[%s1399_s1 + $0x650] sm:$0xff] }
  0x1e   :  { %194 = vmatpush.msrb.mxu0 %v84_v52  ;;  %156 = vmatpush.msra.mxu2 %v79_v54  ;;  %v256_v22 = vld [vmem:[%s1399_s1 + $0x480] sm:$0xff]  ;;  %v301_v24 = vld [vmem:[%s1399_s1 + $0x5e8] sm:$0xff]  ;;  %v311_v27 = vld [vmem:[%s1399_s1 + $0x638] sm:$0xff] }
  0x1f   :  { %214 = vmatpush.msrb.mxu1 %v116_v53  ;;  %175 = vmatpush.msra.mxu3 %v113_v55  ;;  %v272_v25 = vld [vmem:[%s1399_s1 + $0x500] sm:$0xff]  ;;  %v253_v26 = vld [vmem:[%s1399_s1 + $0x468] sm:$0xff]  ;;  %v298_v29 = vld [vmem:[%s1399_s1 + $0x5d0] sm:$0xff] }
  0x20   :  { %195 = vmatpush.msrb.mxu0 %v82_v56  ;;  %157 = vmatpush.msra.mxu2 %v77_v59  ;;  %v269_v28 = vld [vmem:[%s1399_s1 + $0x4e8] sm:$0xff]  ;;  %v266_v30 = vld [vmem:[%s1399_s1 + $0x4d0] sm:$0xff]  ;;  %v308_v32 = vld [vmem:[%s1399_s1 + $0x620] sm:$0xff] }
  0x21   :  { %215 = vmatpush.msrb.mxu1 %v114_v57  ;;  %176 = vmatpush.msra.mxu3 %v111_v60  ;;  %v250_v31 = vld [vmem:[%s1399_s1 + $0x450] sm:$0xff]  ;;  %v295_v33 = vld [vmem:[%s1399_s1 + $0x5b8] sm:$0xff]  ;;  %v305_v36 = vld [vmem:[%s1399_s1 + $0x608] sm:$0xff] }
  0x22   :  { %196 = vmatpush.msrb.mxu0 %v80_v58  ;;  %158 = vmatpush.msra.mxu2 %v75_v63  ;;  %v263_v34 = vld [vmem:[%s1399_s1 + $0x4b8] sm:$0xff]  ;;  %v292_v37 = vld [vmem:[%s1399_s1 + $0x5a0] sm:$0xff]  ;;  %v302_v40 = vld [vmem:[%s1399_s1 + $0x5f0] sm:$0xff] }
  0x23   :  { %216 = vmatpush.msrb.mxu1 %v112_v62  ;;  %177 = vmatpush.msra.mxu3 %v109_v0  ;;  %v247_v35 = vld [vmem:[%s1399_s1 + $0x438] sm:$0xff]  ;;  %v260_v38 = vld [vmem:[%s1399_s1 + $0x4a0] sm:$0xff]  ;;  %v289_v41 = vld [vmem:[%s1399_s1 + $0x588] sm:$0xff] }
  0x24   :  { %197 = vmatpush.msrb.mxu0 %v78_v61  ;;  %159 = vmatpush.msra.mxu2 %v73_v3  ;;  %v244_v39 = vld [vmem:[%s1399_s1 + $0x420] sm:$0xff]  ;;  %v257_v42 = vld [vmem:[%s1399_s1 + $0x488] sm:$0xff]  ;;  %v299_v44 = vld [vmem:[%s1399_s1 + $0x5d8] sm:$0xff] }
  0x25   :  { %217 = vmatpush.msrb.mxu1 %v110_v2  ;;  %178 = vmatpush.msra.mxu3 %v107_v4  ;;  %v241_v43 = vld [vmem:[%s1399_s1 + $0x408] sm:$0xff]  ;;  %v286_v46 = vld [vmem:[%s1399_s1 + $0x570] sm:$0xff]  ;;  %v296_v49 = vld [vmem:[%s1399_s1 + $0x5c0] sm:$0xff] }
  0x26   :  { %198 = vmatpush.msrb.mxu0 %v76_v1  ;;  %331 = vmatpush.msrb.mxu2 %v271_v11  ;;  %v696_v45 = vld [vmem:[%s1399_s1 + $0x60] ss:$8 sm:$0x3]  ;;  %v254_v47 = vld [vmem:[%s1399_s1 + $0x470] sm:$0xff]  ;;  %v283_v50 = vld [vmem:[%s1399_s1 + $0x558] sm:$0xff] }
  0x27   :  { %218 = vmatpush.msrb.mxu1 %v108_v6  ;;  %179 = vmatpush.msra.mxu3 %v105_v7  ;;  %v238_v48 = vld [vmem:[%s1399_s1 + $0x3f0] sm:$0xff]  ;;  %v251_v51 = vld [vmem:[%s1399_s1 + $0x458] sm:$0xff]  ;;  %v23_v52 = vperm.slane %v696_v45, 0  ;;  %v24_v53 = vperm.slane %v696_v45, 1  ;;  %v293_v55 = vld [vmem:[%s1399_s1 + $0x5a8] sm:$0xff] }
  0x28   :  { %199 = vmatpush.msrb.mxu0 %v74_v5  ;;  %332 = vmatpush.msrb.mxu2 %v268_v12  ;;  %v235_v54 = vld [vmem:[%s1399_s1 + $0x3d8] sm:$0xff]  ;;  %v280_v56 = vld [vmem:[%s1399_s1 + $0x540] sm:$0xff]  ;;  %v290_v59 = vld [vmem:[%s1399_s1 + $0x590] sm:$0xff] }
  0x29   :  { %219 = vmatpush.msrb.mxu1 %v106_v8  ;;  %351 = vmatpush.msrb.mxu3 %v319_v9  ;;  %v248_v57 = vld [vmem:[%s1399_s1 + $0x440] sm:$0xff]  ;;  %v277_v62 = vld [vmem:[%s1399_s1 + $0x528] sm:$0xff]  ;;  %v287_v2 = vld [vmem:[%s1399_s1 + $0x578] sm:$0xff] }
  0x2a   :  { %333 = vmatpush.msrb.mxu2 %v265_v14  ;;  %371 = vmatpush.msra.mxu0 %v272_v25  ;;  %v232_v58 = vld [vmem:[%s1399_s1 + $0x3c0] sm:$0xff]  ;;  %v229_v1 = vld [vmem:[%s1399_s1 + $0x3a8] sm:$0xff]  ;;  %v274_v5 = vld [vmem:[%s1399_s1 + $0x510] sm:$0xff] }
  0x2b   :  { %352 = vmatpush.msrb.mxu3 %v316_v10  ;;  %391 = vmatpush.msra.mxu1 %v320_v19  ;;  %v226_v6 = vld [vmem:[%s1399_s1 + $0x390] sm:$0xff]  ;;  %v321_v7 = vld [vmem:[%s1399_s1 + $0x688] sm:$0xff]  ;;  %v315_v11 = vld [vmem:[%s1399_s1 + $0x658] sm:$0xff] }
  0x2c   :  { %334 = vmatpush.msrb.mxu2 %v262_v16  ;;  %372 = vmatpush.msra.mxu0 %v269_v28  ;;  %v273_v8 = vld [vmem:[%s1399_s1 + $0x508] sm:$0xff]  ;;  %v318_v9 = vld [vmem:[%s1399_s1 + $0x670] sm:$0xff]  ;;  %v267_v12 = vld [vmem:[%s1399_s1 + $0x4d8] sm:$0xff] }
  0x2d   :  { %353 = vmatpush.msrb.mxu3 %v313_v13  ;;  %392 = vmatpush.msra.mxu1 %v317_v21  ;;  %v270_v10 = vld [vmem:[%s1399_s1 + $0x4f0] sm:$0xff]  ;;  %v312_v13 = vld [vmem:[%s1399_s1 + $0x640] sm:$0xff]  ;;  %v261_v16 = vld [vmem:[%s1399_s1 + $0x4a8] sm:$0xff] }
  0x2e   :  { %335 = vmatpush.msrb.mxu2 %v259_v18  ;;  %373 = vmatpush.msra.mxu0 %v266_v30  ;;  %v264_v14 = vld [vmem:[%s1399_s1 + $0x4c0] sm:$0xff]  ;;  %v303_v18 = vld [vmem:[%s1399_s1 + $0x5f8] sm:$0xff]  ;;  %v281_v25 = vld [vmem:[%s1399_s1 + $0x548] sm:$0xff] }
  0x2f   :  { %354 = vmatpush.msrb.mxu3 %v310_v15  ;;  %393 = vmatpush.msra.mxu1 %v314_v23  ;;  %v309_v15 = vld [vmem:[%s1399_s1 + $0x628] sm:$0xff]  ;;  %v300_v19 = vld [vmem:[%s1399_s1 + $0x5e0] sm:$0xff]  ;;  %v239_v28 = vld [vmem:[%s1399_s1 + $0x3f8] sm:$0xff] }
  0x30   :  { %336 = vmatpush.msrb.mxu2 %v256_v22  ;;  %374 = vmatpush.msra.mxu0 %v263_v34  ;;  %v284_v21 = vld [vmem:[%s1399_s1 + $0x560] sm:$0xff]  ;;  %v258_v22 = vld [vmem:[%s1399_s1 + $0x490] sm:$0xff]  ;;  %v297_v23 = vld [vmem:[%s1399_s1 + $0x5c8] sm:$0xff] }
  0x31   :  { %355 = vmatpush.msrb.mxu3 %v307_v17  ;;  %394 = vmatpush.msra.mxu1 %v311_v27  ;;  %v306_v17 = vld [vmem:[%s1399_s1 + $0x610] sm:$0xff]  ;;  %v252_v30 = vld [vmem:[%s1399_s1 + $0x460] sm:$0xff]  ;;  %v249_v34 = vld [vmem:[%s1399_s1 + $0x448] sm:$0xff] }
  0x32   :  { %337 = vmatpush.msrb.mxu2 %v253_v26  ;;  %375 = vmatpush.msra.mxu0 %v260_v38  ;;  %v255_v26 = vld [vmem:[%s1399_s1 + $0x478] sm:$0xff]  ;;  %v294_v27 = vld [vmem:[%s1399_s1 + $0x5b0] sm:$0xff]  ;;  %v285_v38 = vld [vmem:[%s1399_s1 + $0x568] sm:$0xff] }
  0x33   :  { %356 = vmatpush.msrb.mxu3 %v304_v20  ;;  %395 = vmatpush.msra.mxu1 %v308_v32  ;;  %v245_v20 = vld [vmem:[%s1399_s1 + $0x428] sm:$0xff]  ;;  %v236_v32 = vld [vmem:[%s1399_s1 + $0x3e0] sm:$0xff] }
  0x34   :  { %338 = vmatpush.msrb.mxu2 %v250_v31  ;;  %376 = vmatpush.msra.mxu0 %v257_v42  ;;  %v291_v31 = vld [vmem:[%s1399_s1 + $0x598] sm:$0xff]  ;;  %v237_v45 = vld [vmem:[%s1399_s1 + $0x3e8] sm:$0xff] }
  0x35   :  { %357 = vmatpush.msrb.mxu3 %v301_v24  ;;  %396 = vmatpush.msra.mxu1 %v305_v36  ;;  %v242_v24 = vld [vmem:[%s1399_s1 + $0x410] sm:$0xff]  ;;  %v233_v36 = vld [vmem:[%s1399_s1 + $0x3c8] sm:$0xff]  ;;  %v227_v42 = vld [vmem:[%s1399_s1 + $0x398] sm:$0xff] }
  0x36   :  { %339 = vmatpush.msrb.mxu2 %v247_v35  ;;  %377 = vmatpush.msra.mxu0 %v254_v47  ;;  %v288_v35 = vld [vmem:[%s1399_s1 + $0x580] sm:$0xff]  ;;  %v234_v47 = vld [vmem:[%s1399_s1 + $0x3d0] sm:$0xff] }
  0x37   :  { %358 = vmatpush.msrb.mxu3 %v298_v29  ;;  %397 = vmatpush.msra.mxu1 %v302_v40  ;;  %v278_v29 = vld [vmem:[%s1399_s1 + $0x530] sm:$0xff]  ;;  %v243_v40 = vld [vmem:[%s1399_s1 + $0x418] sm:$0xff] }
  0x38   :  { %340 = vmatpush.msrb.mxu2 %v244_v39  ;;  %378 = vmatpush.msra.mxu0 %v251_v51  ;;  %v230_v39 = vld [vmem:[%s1399_s1 + $0x3b0] sm:$0xff] }
  0x39   :  { %359 = vmatpush.msrb.mxu3 %v295_v33  ;;  %398 = vmatpush.msra.mxu1 %v299_v44  ;;  %v275_v33 = vld [vmem:[%s1399_s1 + $0x518] sm:$0xff] }
  0x3a   :  { %341 = vmatpush.msrb.mxu2 %v241_v43  ;;  %379 = vmatpush.msra.mxu0 %v248_v57  ;;  %v240_v43 = vld [vmem:[%s1399_s1 + $0x400] sm:$0xff]  ;;  %v279_v44 = vld [vmem:[%s1399_s1 + $0x538] sm:$0xff] }
  0x3b   :  { %360 = vmatpush.msrb.mxu3 %v292_v37  ;;  %399 = vmatpush.msra.mxu1 %v296_v49  ;;  %v246_v37 = vld [vmem:[%s1399_s1 + $0x430] sm:$0xff]  ;;  %v228_v49 = vld [vmem:[%s1399_s1 + $0x3a0] sm:$0xff] }
  0x3c   :  { %342 = vmatpush.msrb.mxu2 %v238_v48  ;;  %380 = vmatpush.msra.mxu0 %v245_v20  ;;  %v231_v48 = vld [vmem:[%s1399_s1 + $0x3b8] sm:$0xff] }
  0x3d   :  { %361 = vmatpush.msrb.mxu3 %v289_v41  ;;  %400 = vmatpush.msra.mxu1 %v293_v55  ;;  %v282_v41 = vld [vmem:[%s1399_s1 + $0x550] sm:$0xff]  ;;  %v460_v20 = vld [vmem:[%s1399_s1 + $0x738] sm:$0xff] }
  0x3e   :  { %343 = vmatpush.msrb.mxu2 %v235_v54  ;;  %381 = vmatpush.msra.mxu0 %v242_v24  ;;  %v458_v24 = vld [vmem:[%s1399_s1 + $0x708] sm:$0xff] }
  0x3f   :  { %362 = vmatpush.msrb.mxu3 %v286_v46  ;;  %401 = vmatpush.msra.mxu1 %v290_v59  ;;  %v276_v46 = vld [vmem:[%s1399_s1 + $0x520] sm:$0xff] }
  0x40   :  { %344 = vmatpush.msrb.mxu2 %v232_v58  ;;  %382 = vmatpush.msra.mxu0 %v239_v28  ;;  %v493_v28 = vld [vmem:[%s1399_s1 + $0xa50] sm:$0xff] }
  0x41   :  { %363 = vmatpush.msrb.mxu3 %v283_v50  ;;  %402 = vmatpush.msra.mxu1 %v287_v2  ;;  %v699_v50 = vld [vmem:[%s1399_s1 + $0x378] ss:$8 sm:$0x3] }
  0x42   :  { %345 = vmatpush.msrb.mxu2 %v229_v1  ;;  %383 = vmatpush.msra.mxu0 %v236_v32  ;;  %v141_v51 = vperm.slane %v699_v50, 1  ;;  %v469_v1 = vld [vmem:[%s1399_s1 + $0x810] sm:$0xff]  ;;  %v468_v2 = vld [vmem:[%s1399_s1 + $0x7f8] sm:$0xff]  ;;  %v491_v32 = vld [vmem:[%s1399_s1 + $0xa20] sm:$0xff] }
  0x43   :  { %364 = vmatpush.msrb.mxu3 %v280_v56  ;;  %403 = vmatpush.msra.mxu1 %v284_v21  ;;  %v140_v56 = vperm.slane %v699_v50, 0  ;;  %v473_v21 = vld [vmem:[%s1399_s1 + $0x870] sm:$0xff] }
  0x44   :  { %346 = vmatpush.msrb.mxu2 %v226_v6  ;;  %384 = vmatpush.msra.mxu0 %v233_v36  ;;  %v466_v6 = vld [vmem:[%s1399_s1 + $0x7c8] sm:$0xff]  ;;  %v488_v36 = vld [vmem:[%s1399_s1 + $0x9d8] sm:$0xff] }
  0x45   :  { %365 = vmatpush.msrb.mxu3 %v277_v62  ;;  %404 = vmatpush.msra.mxu1 %v281_v25  ;;  %v471_v25 = vld [vmem:[%s1399_s1 + $0x840] sm:$0xff] }
  0x46   :  { %385 = vmatpush.msra.mxu0 %v230_v39  ;;  %v700_v39 = vld [vmem:[%s1399_s1 + $0x690] ss:$8 sm:$0x7] }
  0x47   :  { %366 = vmatpush.msrb.mxu3 %v274_v5  ;;  %405 = vmatpush.msra.mxu1 %v278_v29  ;;  %v482_v5 = vld [vmem:[%s1399_s1 + $0x948] sm:$0xff]  ;;  %v456_v29 = vld [vmem:[%s1399_s1 + $0x6d8] sm:$0xff] }
  0x48   :  { %386 = vmatpush.msra.mxu0 %v227_v42 }
  0x49   :  { %406 = vmatpush.msra.mxu1 %v275_v33  ;;  %v454_v33 = vld [vmem:[%s1399_s1 + $0x6a8] sm:$0xff] }
  0x86   :  { %v48_v60 = vpop.f32.mrf.mxu0 }
  0x87   :  { %v68_v61 = vpop.f32.mrf.mxu1  ;;  %v49_v63 = vadd.f32 %v48_v60, %v23_v52 }
  0x88   :  { %v69_v0 = vadd.f32 %v68_v61, %v24_v53 }
  0x89   :  { %v71_v3 = vmax.f32 %v49_v63, 0.0  ;;  %v485_v63 = vld [vmem:[%s1399_s1 + $0x990] sm:$0xff] }
  0x8a   :  { %v72_v4 = vmax.f32 %v69_v0, 0.0  ;;  %v484_v0 = vld [vmem:[%s1399_s1 + $0x978] sm:$0xff] }
  0x8b   :  { %160 = vmatmul.f32.vlgmr.msra.gmra.mxu2 %v71_v3  ;;  %200 = vmatmul.f32.vlgmr.msrb.gmra.mxu0 %v71_v3  ;;  %v483_v3 = vld [vmem:[%s1399_s1 + $0x960] sm:$0xff] }
  0x8c   :  { %180 = vmatmul.f32.vlgmr.msra.gmra.mxu3 %v72_v4  ;;  %220 = vmatmul.f32.vlgmr.msrb.gmra.mxu1 %v72_v4  ;;  %v467_v4 = vld [vmem:[%s1399_s1 + $0x7e0] sm:$0xff] }
  0x8d   :  { %431 = vmatpush.msra.mxu3 %v321_v7  ;;  %411 = vmatpush.msra.mxu2 %v273_v8  ;;  %v481_v7 = vld [vmem:[%s1399_s1 + $0x930] sm:$0xff] }
  0x8e   :  { %519 = vmatpush.msrb.mxu1 %v485_v63  ;;  %499 = vmatpush.msrb.mxu0 %v469_v1  ;;  %v465_v8 = vld [vmem:[%s1399_s1 + $0x7b0] sm:$0xff] }
  0x8f   :  { %432 = vmatpush.msra.mxu3 %v318_v9  ;;  %412 = vmatpush.msra.mxu2 %v270_v10  ;;  %v480_v9 = vld [vmem:[%s1399_s1 + $0x918] sm:$0xff] }
  0x90   :  { %520 = vmatpush.msrb.mxu1 %v484_v0  ;;  %500 = vmatpush.msrb.mxu0 %v468_v2  ;;  %v464_v10 = vld [vmem:[%s1399_s1 + $0x798] sm:$0xff] }
  0x91   :  { %433 = vmatpush.msra.mxu3 %v315_v11  ;;  %413 = vmatpush.msra.mxu2 %v267_v12  ;;  %v479_v11 = vld [vmem:[%s1399_s1 + $0x900] sm:$0xff]  ;;  %v478_v12 = vld [vmem:[%s1399_s1 + $0x8e8] sm:$0xff] }
  0x92   :  { %521 = vmatpush.msrb.mxu1 %v483_v3  ;;  %501 = vmatpush.msrb.mxu0 %v467_v4 }
  0x93   :  { %434 = vmatpush.msra.mxu3 %v312_v13  ;;  %414 = vmatpush.msra.mxu2 %v264_v14  ;;  %v477_v13 = vld [vmem:[%s1399_s1 + $0x8d0] sm:$0xff]  ;;  %v463_v14 = vld [vmem:[%s1399_s1 + $0x780] sm:$0xff] }
  0x94   :  { %522 = vmatpush.msrb.mxu1 %v482_v5  ;;  %502 = vmatpush.msrb.mxu0 %v466_v6 }
  0x95   :  { %435 = vmatpush.msra.mxu3 %v309_v15  ;;  %415 = vmatpush.msra.mxu2 %v261_v16  ;;  %v476_v15 = vld [vmem:[%s1399_s1 + $0x8b8] sm:$0xff]  ;;  %v462_v16 = vld [vmem:[%s1399_s1 + $0x768] sm:$0xff] }
  0x96   :  { %523 = vmatpush.msrb.mxu1 %v481_v7  ;;  %503 = vmatpush.msrb.mxu0 %v465_v8  ;;  %v586_v8 = vlaneseq }
  0x97   :  { %436 = vmatpush.msra.mxu3 %v306_v17  ;;  %416 = vmatpush.msra.mxu2 %v258_v22  ;;  %v475_v17 = vld [vmem:[%s1399_s1 + $0x8a0] sm:$0xff] }
  0x98   :  { %524 = vmatpush.msrb.mxu1 %v480_v9  ;;  %504 = vmatpush.msrb.mxu0 %v464_v10  ;;  %v459_v22 = vld [vmem:[%s1399_s1 + $0x720] sm:$0xff]  ;;  %v587_v10 = vshrl.u32 %v586_v8, 7 }
  0x99   :  { %437 = vmatpush.msra.mxu3 %v303_v18  ;;  %417 = vmatpush.msra.mxu2 %v255_v26  ;;  %v461_v18 = vld [vmem:[%s1399_s1 + $0x750] sm:$0xff] }
  0x9a   :  { %525 = vmatpush.msrb.mxu1 %v479_v11  ;;  %505 = vmatpush.msrb.mxu0 %v463_v14  ;;  %v457_v26 = vld [vmem:[%s1399_s1 + $0x6f0] sm:$0xff]  ;;  %v591_v11 = vand.u32 127, %v586_v8 }
  0x9b   :  { %438 = vmatpush.msra.mxu3 %v300_v19  ;;  %418 = vmatpush.msra.mxu2 %v252_v30  ;;  %v474_v19 = vld [vmem:[%s1399_s1 + $0x888] sm:$0xff]  ;;  %v492_v30 = vld [vmem:[%s1399_s1 + $0xa38] sm:$0xff] }
  0x9c   :  { %526 = vmatpush.msrb.mxu1 %v478_v12  ;;  %506 = vmatpush.msrb.mxu0 %v462_v16  ;;  %v589_v12 = vadd.s32 16, %v587_v10  ;;  %v592_v14 = vsub.s32 %v587_v10, %v591_v11  ;;  %vm616_vm4 = vcmp.lt.s32.totalorder %v591_v11, 6 }
  0x9d   :  { %439 = vmatpush.msra.mxu3 %v297_v23  ;;  %419 = vmatpush.msra.mxu2 %v249_v34  ;;  %v472_v23 = vld [vmem:[%s1399_s1 + $0x858] sm:$0xff]  ;;  %v490_v34 = vld [vmem:[%s1399_s1 + $0xa08] sm:$0xff] }
  0x9e   :  { %527 = vmatpush.msrb.mxu1 %v477_v13  ;;  %507 = vmatpush.msrb.mxu0 %v461_v18  ;;  %v588_v13 = vadd.s32 8, %v587_v10  ;;  %v594_v16 = vsub.s32 %v589_v12, %v591_v11  ;;  %vm595_vm2 = vcmp.eq.s32.totalorder %v592_v14, 0  ;;  %vm598_vm3 = vcmp.eq.s32.totalorder %v592_v14, 6 }
  0x9f   :  { %440 = vmatpush.msra.mxu3 %v294_v27  ;;  %420 = vmatpush.msra.mxu2 %v246_v37  ;;  %v470_v27 = vld [vmem:[%s1399_s1 + $0x828] sm:$0xff]  ;;  %v487_v37 = vld [vmem:[%s1399_s1 + $0x9c0] sm:$0xff]  ;;  %vm601_vm5 = vmor %vm595_vm2, %vm598_vm3  ;;  %v1404_v18 = vmov 0 }
  0xa0   :  { %528 = vmatpush.msrb.mxu1 %v476_v15  ;;  %508 = vmatpush.msrb.mxu0 %v460_v20  ;;  %vm597_vm6 = vcmp.eq.s32.totalorder %v594_v16, 0  ;;  %vm600_vm7 = vcmp.eq.s32.totalorder %v594_v16, 6  ;;  %vm606_vm8 = vcmp.eq.s32.totalorder %v594_v16, 12  ;;  %vm612_vm9 = vcmp.eq.s32.totalorder %v594_v16, 18  ;;  %vm1385_vm10 = vmand %vm601_vm5, %vm616_vm4 }
  0xa1   :  { %441 = vmatpush.msra.mxu3 %v291_v31  ;;  %421 = vmatpush.msra.mxu2 %v243_v40  ;;  %v455_v31 = vld [vmem:[%s1399_s1 + $0x6c0] sm:$0xff]  ;;  %v326_v40 = vperm.slane %v700_v39, 1  ;;  %v1405_v18 = vsel %vm1385_vm10, 4294967295, %v1404_v18  ;;  %vm603_vm11 = vmor %vm597_vm6, %vm600_vm7  ;;  %v726_v20 = vmov 0.0  }
  0xa2   :  { %529 = vmatpush.msrb.mxu1 %v475_v17  ;;  %509 = vmatpush.msrb.mxu0 %v459_v22  ;;  %v593_v17 = vsub.s32 %v588_v13, %v591_v11  ;;  %vm609_vm12 = vmor %vm603_vm11, %vm606_vm8  ;;  %vm1406_vm8 = vnez %v1405_v18 }
  0xa3   :  { %442 = vmatpush.msra.mxu3 %v288_v35  ;;  %422 = vmatpush.msra.mxu2 %v240_v43  ;;  %v489_v35 = vld [vmem:[%s1399_s1 + $0x9f0] sm:$0xff]  ;;  %vm615_vm15 = vmor %vm609_vm12, %vm612_vm9  ;;  %vm623_vm9 = vcmp.ge.s32.totalorder %v591_v11, 6 }
  0xa4   :  { %530 = vmatpush.msrb.mxu1 %v474_v19  ;;  %510 = vmatpush.msrb.mxu0 %v458_v24  ;;  %vm596_vm13 = vcmp.eq.s32.totalorder %v593_v17, 0  ;;  %vm599_vm14 = vcmp.eq.s32.totalorder %v593_v17, 6  ;;  %vm605_vm0 = vcmp.eq.s32.totalorder %v593_v17, 12 }
  0xa5   :  { %443 = vmatpush.msra.mxu3 %v285_v38  ;;  %423 = vmatpush.msra.mxu2 %v237_v45  ;;  %v486_v38 = vld [vmem:[%s1399_s1 + $0x9a8] sm:$0xff]  ;;  %vm602_vm2 = vmor %vm596_vm13, %vm599_vm14 }
  0xa6   :  { %531 = vmatpush.msrb.mxu1 %v473_v21  ;;  %511 = vmatpush.msrb.mxu0 %v457_v26  ;;  %vm608_vm5 = vmor %vm602_vm2, %vm605_vm0 }
  0xa7   :  { %444 = vmatpush.msra.mxu3 %v282_v41  ;;  %424 = vmatpush.msra.mxu2 %v234_v47  ;;  %vm618_vm10 = vmand %vm608_vm5, %vm616_vm4 }
  0xa8   :  { %532 = vmatpush.msrb.mxu1 %v472_v23  ;;  %512 = vmatpush.msrb.mxu0 %v456_v29 }
  0xa9   :  { %445 = vmatpush.msra.mxu3 %v279_v44  ;;  %425 = vmatpush.msra.mxu2 %v231_v48  ;;  %v325_v44 = vperm.slane %v700_v39, 0 }
  0xaa   :  { %533 = vmatpush.msrb.mxu1 %v471_v25  ;;  %513 = vmatpush.msrb.mxu0 %v455_v31  ;;  %v727_v25 = vmov 1.0  }
  0xab   :  { %446 = vmatpush.msra.mxu3 %v276_v46  ;;  %426 = vmatpush.msra.mxu2 %v228_v49 }
  0xac   :  { %534 = vmatpush.msrb.mxu1 %v470_v27  ;;  %514 = vmatpush.msrb.mxu0 %v454_v33 }
 0x108   :  { %v201_v52 = vpop.f32.mrf.mxu0 }
 0x109   :  { %v202_v53 = vadd.f32 %v201_v52, %v141_v51  ;;  %v221_v54 = vpop.f32.mrf.mxu1  ;;  %v327_v52 = vperm.slane %v700_v39, 2 }
 0x10b   :  { %v222_v55 = vadd.f32 %v221_v54, %v202_v53 }
 0x10d   :  { %v225_v57 = vmax.f32 %v222_v55, 0.0 }
 0x10e   :  { %v161_v58 = vpop.f32.mrf.mxu2 }
 0x10f   :  { %v162_v59 = vadd.f32 %v161_v58, %v140_v56  ;;  %367 = vmatmul.f32.vlgmr.msrb.gmra.mxu3 %v225_v57  ;;  %407 = vmatmul.f32.vlgmr.msra.gmra.mxu1 %v225_v57  ;;  %v181_v60 = vpop.f32.mrf.mxu3  ;;  %v494_v58 = vld [vmem:[%s1399_s1 + $0xa68] ss:$0 sm:$0xff]  ;;  %s728_s1 = smov 80  }
 0x111   :  { %v182_v61 = vadd.f32 %v181_v60, %v162_v59 }
 0x113   :  { %v224_v62 = vmax.f32 %v182_v61, 0.0 }
 0x115   :  { %687 = vrot.lane.b32.xlu2 %v224_v62, %s723_s4  ;;  %347 = vmatmul.f32.vlgmr.msrb.gmra.mxu2 %v224_v62 }
 0x116   :  { %387 = vmatmul.f32.vlgmr.msra.gmra.mxu0 %v224_v62  ;;  %547 = vmatpush.msrb.mxu2 %v493_v28 }
 0x117   :  { %447 = vmatmul.f32.vlgmr.msra.gmra.mxu3 %v225_v57 }
 0x118   :  { %548 = vmatpush.msrb.mxu2 %v492_v30 }
 0x11a   :  { %549 = vmatpush.msrb.mxu2 %v491_v32 }
 0x11c   :  { %550 = vmatpush.msrb.mxu2 %v490_v34 }
 0x11d   :  { %427 = vmatmul.f32.vlgmr.msra.gmra.mxu2 %v224_v62 }
 0x11e   :  { %551 = vmatpush.msrb.mxu2 %v489_v35  ;;  %v624_v35 = vsel %vm623_vm9, 1.0, %v726_v20 }
 0x120   :  { %552 = vmatpush.msrb.mxu2 %v488_v36 }
 0x122   :  { %553 = vmatpush.msrb.mxu2 %v487_v37 }
 0x124   :  { %554 = vmatpush.msrb.mxu2 %v486_v38 }
 0x18c   :  { %v408_v43 = vpop.f32.mrf.mxu1 }
 0x192   :  { %v368_v46 = vpop.f32.mrf.mxu3 }
 0x193   :  { %v388_v41 = vpop.f32.mrf.mxu0 }
 0x194   :  { %v389_v42 = vadd.f32 %v388_v41, %v326_v40 }
 0x196   :  { %v409_v45 = vadd.f32 %v408_v43, %v389_v42 }
 0x198   :  { %v452_v47 = vmax.f32 %v409_v45, 0.0  ;;  %v348_v48 = vpop.f32.mrf.mxu2 }
 0x199   :  { %v349_v49 = vadd.f32 %v348_v48, %v325_v44  ;;  %v688_v44 = vpop.permute.xlu2 %687 }
 0x19a   :  { %535 = vmatmul.f32.vlgmr.msrb.gmra.mxu1 %v452_v47  ;;  %v448_v55 = vpop.f32.mrf.mxu3 }
 0x19b   :  { %v369_v50 = vadd.f32 %v368_v46, %v349_v49 }
 0x19d   :  { %v451_v51 = vmax.f32 %v369_v50, 0.0 }
 0x19f   :  { %515 = vmatmul.f32.vlgmr.msrb.gmra.mxu0 %v451_v51 }
 0x1a0   :  { %v428_v53 = vpop.f32.mrf.mxu2 }
 0x1a1   :  { %v429_v54 = vadd.f32 %v428_v53, %v327_v52 }
 0x1a3   :  { %v449_v56 = vadd.f32 %v448_v55, %v429_v54 }
 0x1a5   :  { %v453_v57 = vmax.f32 %v449_v56, 0.0 }
 0x1a7   :  { %701 = vmatmul.msk.f32.vlgmr.msrb.gmra.mxu2 %vm1402_vm1, %v453_v57  ;;  %vm619_vm1 = vmand %vm615_vm15, %vm616_vm4  ;;  %vm628_vm4 = vcmask 195584  }
 0x1a8   :  { %v622_v21 = vsel %vm619_vm1, 1.0, %v726_v20 }
 0x1a9   :  { %644 = vmatpush.msrb.mxu3 %v622_v21  ;;  %674 = vmatpush.msra.mxu0 %v622_v21 }
 0x1ab   :  { %703 = vmatpush.msk.msrb.mxu3 %vm618_vm10, %v727_v25  ;;  %706 = vmatpush.msk.msra.mxu0 %vm618_vm10, %v727_v25  ;;  %vm1407_vm10 = vcmask 523264  }
 0x1ad   :  { %704 = vmatpush.msk.msrb.mxu3 %vm1406_vm8, %v727_v25  ;;  %707 = vmatpush.msk.msra.mxu0 %vm1406_vm8, %v727_v25 }
 0x217   :  { %v536_v61 = vpop.f32.mrf.mxu1 }
 0x21c   :  { %v516_v59 = vpop.f32.mrf.mxu0 }
 0x21d   :  { %v517_v60 = vadd.f32 %v516_v59, %v494_v58 }
 0x21f   :  { %v537_v62 = vadd.f32 %v536_v61, %v517_v60 }
 0x22a   :  { %v556_v63 = vpop.f32.mrf.mxu2 }
 0x22b   :  { %v557_v0 = vadd.f32 %v556_v63, %v537_v62 }
 0x22d   :  { %v578_v1 = vsub.f32 0.0, %v557_v0  ;;  %v702_v4 = vmul.f32 -1.442695, %v557_v0 }
 0x22f   :  { %v579_v2 = vmul.f32 1.442695, %v578_v1 }
 0x231   :  { %715 = vpow2.f32 %v579_v2 }
 0x232   :  { %717 = vpow2.f32 %v702_v4 }
 0x237   :  { %v716_v3 = vpop.eup %715 }
 0x238   :  { %582 = vrot.lane.b32.xlu0 %v716_v3, %s724_s30  ;;  %v718_v5 = vpop.eup %717 }
 0x239   :  { %v562_v6 = vadd.f32 1.0, %v718_v5 }
 0x23b   :  { %719 = vrcp.f32 %v562_v6  ;;  %v574_v23 = vand.u32 2147483648, %v562_v6  ;;  %vm568_vm6 = vweird.f32 %v562_v6  ;;  %v572_v24 = vand.u32 2147483647, %v562_v6 }
 0x23d   :  { %v575_v27 = vor.u32 1.1754944e-38, %v574_v23  ;;  %vm573_vm1 = vcmp.eq.f32.partialorder %v572_v24, 8.507059e+37 }
 0x240   :  { %652 = vrot.lane.b32.xlu0 %v557_v0, %s725_s3 }
 0x241   :  { %v720_v7 = vpop.eup %719 }
 0x242   :  { %v564_v9 = vmul.f32 %v720_v7, %v562_v6  ;;  %vm569_vm3 = vweird.f32 %v720_v7 }
 0x243   :  { %vm570_vm7 = vmor %vm568_vm6, %vm569_vm3 }
 0x244   :  { %v565_v15 = vsub.f32 1.0, %v564_v9 }
 0x246   :  { %v566_v19 = vmul.f32 %v720_v7, %v565_v15 }
 0x248   :  { %v567_v22 = vadd.f32 %v720_v7, %v566_v19 }
 0x24a   :  { %v571_v26 = vsel %vm570_vm7, %v720_v7, %v567_v22 }
 0x24b   :  { %v576_v29 = vsel %vm573_vm1, %v575_v27, %v571_v26 }
 0x2aa   :  { %v583_v28 = vpop.permute.xlu0 %582 }
 0x2ab   :  { %v585_v30 = vmul.f32 %v583_v28, %v576_v29 }
 0x2ad   :  { %626 = vrot.lane.b32.xlu1 %v585_v30, %s728_s1 }
 0x2b2   :  { %v653_v31 = vpop.permute.xlu0 %652 }
 0x2b3   :  { %v655_v32 = vmul.f32 %v653_v31, %v585_v30 }
 0x2b5   :  { %657 = vrot.lane.b32.xlu1 %v655_v32, %s728_s1 }
 0x31f   :  { %v627_v33 = vpop.permute.xlu1 %626 }
 0x320   :  { %705 = vmatmul.msk.f32.vlgmr.msrb.gmra.mxu3 %vm628_vm4, %v627_v33 }
 0x327   :  { %v658_v34 = vpop.permute.xlu1 %657 }
 0x328   :  { %708 = vmatmul.msk.f32.vlgmr.msra.gmra.mxu0 %vm628_vm4, %v658_v34 }
 0x3a3   :  { %v648_v36 = vpop.f32.mrf.mxu3 }
 0x3a4   :  { %v649_v37 = vadd.f32 %v648_v36, %v624_v35 }
 0x3a5   :  { %v678_v42 = vpop.f32.mrf.mxu0 }
 0x3a6   :  { %721 = vrcp.f32 %v649_v37 }
 0x3ac   :  { %v722_v38 = vpop.eup %721 }
 0x3ad   :  { %v682_v39 = vmul.f32 %v722_v38, %v649_v37 }
 0x3af   :  { %v683_v40 = vsub.f32 2.0, %v682_v39 }
 0x3b1   :  { %v684_v41 = vmul.f32 %v722_v38, %v683_v40 }
 0x3b3   :  { %v685_v43 = vmul.f32 %v684_v41, %v678_v42 }
 0x3b5   :  { %v690_v45 = vsel %vm1407_vm10, %v685_v43, %v688_v44 }
 0x3b6   :  { %691 = vst [vmem:[%s1401_s2] sm:$0xff] %v690_v45 }

</bundles_post_ra>
